<compile_context>
chip_gen: v5e
topology: v5e:2x2
jax: 0.10.0
libtpu: 0.0.40
codegen_flags: <defaults>
</compile_context>

<pallas_src>
import functools

import jax
import jax.numpy as jnp
from jax.experimental import pallas as pl
from jax.experimental.pallas import tpu as pltpu

LANE = 128


def _out_pad(fan_out):
    # Lane-align the out-feature axis.  For layers >= 256 wide, align to 256
    # to fill the 2x256^2 MXU on v6e/v7x; 128 is enough below that (and on v5e).
    mult = 256 if fan_out >= 256 else LANE
    return ((fan_out + mult - 1) // mult) * mult


def _fused_mlp_kernel(*refs, num_layers, act, emit_mus):
    """Fused SplitMLP forward.

    refs = [x, w0, b0, ..., w_{L-1}, b_{L-1},   (inputs)
            out, mus]                           (outputs; mus only for relu)
    wi: (F_in_i, F_out_i_pad) bf16, bi: (1, F_out_i_pad) f32 — pre-transposed
    and zero-padded at __init__.  Zero padding is inert: ReLU(0)=0, and for
    sigmoid the 0.5 rows multiply zero rows of the next padded weight; padded
    lanes of the outputs are sliced off on the host.
    """
    n_in = 1 + 2 * num_layers
    x_ref = refs[0]
    w_refs = [refs[1 + 2 * i] for i in range(num_layers)]
    b_refs = [refs[2 + 2 * i] for i in range(num_layers)]
    out_ref = refs[n_in]
    mus_ref = refs[n_in + 1] if emit_mus else None

    h = x_ref[...].astype(jnp.float32)
    mus_rows = []
    # "Lower" layers: Linear + activation.  Static Python loop -> fully
    # unrolled; activations never leave vregs/VMEM between layers.
    for i in range(num_layers - 1):
        z = jnp.dot(h.astype(jnp.bfloat16), w_refs[i][...],
                    preferred_element_type=jnp.float32)
        z = z + b_refs[i][...]
        if act == "relu":
            if emit_mus:
                # torch records mean((x >= 0)) on the ReLU *input*, i.e. on the
                # preceding Linear's output.  Sublane reduction (XLU) hides
                # under the next layer's matmul.
                mus_rows.append(jnp.mean((z >= 0.0).astype(jnp.float32),
                                         axis=0, keepdims=True))
            h = jnp.maximum(z, 0.0)
        else:  # sigmoid (EUP slot; overlaps the next matmul push)
            h = jax.nn.sigmoid(z)

    # Final Linear (no activation).
    y = jnp.dot(h.astype(jnp.bfloat16), w_refs[-1][...],
                preferred_element_type=jnp.float32)
    y = y + b_refs[-1][...]
    out_ref[...] = y.astype(out_ref.dtype)

    if emit_mus:
        # Merge per-layer mus rows into ONE lane-dense (L-1, max_hp) store.
        maxp = mus_ref.shape[1]
        padded = []
        for row in mus_rows:
            if row.shape[1] < maxp:
                row = jnp.concatenate(
                    [row, jnp.zeros((1, maxp - row.shape[1]), jnp.float32)],
                    axis=1)
            padded.append(row)
        block = padded[0] if len(padded) == 1 else jnp.concatenate(padded, axis=0)
        mus_ref[...] = block


class SplitMLPPallas:
    """JAX/Pallas port of SplitMLP (one fused, grid-less kernel per forward)."""

    def __init__(self, size, act="relu", key=None):
        if act not in ("relu", "sigmoid"):
            raise ValueError(
                "%s activation layer hasn't been implemented in this code" % act)
        if key is None:
            key = jax.random.PRNGKey(0)
        self.size = tuple(int(s) for s in size)
        self.act = act
        self.num_layers = len(self.size) - 1
        self._call_cache = {}
        self._label_cache = {}

        # PyTorch-convention params (kept for inspection) and kernel-ready
        # packed params: W transposed to (in, out), zero-padded on the
        # out-feature axis, stored bf16; bias padded, stored f32.  Done ONCE.
        self.params = []
        self.packed = []
        in_pad = self.size[0]                     # x itself is not padded
        for i in range(self.num_layers):
            key, kw, kb = jax.random.split(key, 3)
            fan_in, fan_out = self.size[i], self.size[i + 1]
            bound = 1.0 / float(fan_in) ** 0.5
            W = jax.random.uniform(kw, (fan_out, fan_in), jnp.float32,
                                   minval=-bound, maxval=bound)
            b = jax.random.uniform(kb, (fan_out,), jnp.float32,
                                   minval=-bound, maxval=bound)
            self.params.append((W, b))

            op = _out_pad(fan_out)
            Wt = jnp.zeros((in_pad, op), jnp.float32)
            Wt = Wt.at[:fan_in, :fan_out].set(W.T)
            bp = jnp.zeros((1, op), jnp.float32)
            bp = bp.at[0, :fan_out].set(b)
            self.packed.append((Wt.astype(jnp.bfloat16), bp))
            in_pad = op

    # ------------------------------------------------------------------ #
    @property
    def _emit_mus(self):
        return self.act == "relu" and self.num_layers > 1

    def _build_call(self, batch):
        emit_mus = self._emit_mus
        n_inputs = 1 + 2 * self.num_layers
        vmem_spec = pl.BlockSpec(memory_space=pltpu.MemorySpace.VMEM)
        in_specs = [vmem_spec] * n_inputs

        out_pad_final = self.packed[-1][0].shape[1]
        out_shapes = [jax.ShapeDtypeStruct((batch, out_pad_final), jnp.float32)]
        out_specs = [vmem_spec]
        if emit_mus:
            max_hp = max(self.packed[i][0].shape[1]
                         for i in range(self.num_layers - 1))
            out_shapes.append(
                jax.ShapeDtypeStruct((self.num_layers - 1, max_hp), jnp.float32))
            out_specs.append(vmem_spec)

        # Only raise the scoped-VMEM limit when we actually need it
        # (v5e default 16 MiB, v6e/v7x 32 MiB; v7x physical is 64 MiB).
        weight_bytes = sum(int(Wt.size) * Wt.dtype.itemsize
                           + int(bp.size) * bp.dtype.itemsize
                           for Wt, bp in self.packed)
        max_width = max([self.size[0]] + [Wt.shape[1] for Wt, _ in self.packed])
        needed = weight_bytes + 4 * batch * max_width * 4 + (2 << 20)
        compiler_params = None
        if needed > (12 << 20):
            compiler_params = pltpu.CompilerParams(
                vmem_limit_bytes=int(min(needed, 64 << 20)))
            # TODO(synk): above ~40-48 MiB of packed weights (v7x) switch to a
            # per-layer weight-streaming pipeline (memory_space=pl.ANY +
            # pltpu.emit_pipeline) instead of all-weights-resident.

        kernel = functools.partial(_fused_mlp_kernel,
                                   num_layers=self.num_layers,
                                   act=self.act, emit_mus=emit_mus)
        # TODO(synk): for batches of hundreds of rows, tile the batch axis with
        # a real grid ("parallel" for v7x's 2 TCs) and emit per-tile mus
        # partial sums reduced/divided outside the kernel.
        call = pl.pallas_call(
            kernel,
            out_shape=tuple(out_shapes),
            in_specs=in_specs,
            out_specs=tuple(out_specs),
            compiler_params=compiler_params,
        )
        return jax.jit(call)

    def _fused_call(self, x):
        B = x.shape[0]
        if B not in self._call_cache:
            self._call_cache[B] = self._build_call(B)
        flat_inputs = [x]
        for Wt, bp in self.packed:
            flat_inputs += [Wt, bp]
        outs = self._call_cache[B](*flat_inputs)
        if not isinstance(outs, (tuple, list)):
            outs = (outs,)
        return outs

    def _label_ids(self, label_set):
        if isinstance(label_set, (list, tuple)):
            k = tuple(int(v) for v in label_set)
            if k not in self._label_cache:
                self._label_cache[k] = jnp.asarray(k, dtype=jnp.int32)
            return self._label_cache[k]
        return jnp.asarray(label_set)

    def forward(self, x, label_set, return_mus=False):
        # TODO(synk): if label_set is fixed per model instance, fold it into
        # the packed final layer at __init__ and drop this host-side gather.
        outs = self._fused_call(x)
        y = outs[0][:, :self.size[-1]]
        y = y[:, self._label_ids(label_set)]          # x[:, label_set]
        if return_mus:
            if not self._emit_mus:
                raise ValueError("no ReLU layers -> no mus to return")
            mus_pad = outs[1]
            mus = jnp.stack([mus_pad[i, :self.size[i + 1]]
                             for i in range(self.num_layers - 1)])
            return y, mus
        return y

    # pure-JAX reference (mirrors the torch forward; same bf16-weight / f32-
    # accumulate numerics as the kernel so the comparison is apples-to-apples)
    def forward_ref(self, x, label_set, return_mus=False):
        mus = []
        h = x.astype(jnp.float32)
        for i in range(self.num_layers - 1):
            Wt, bp = self.packed[i]
            z = jnp.dot(h.astype(jnp.bfloat16), Wt,
                        preferred_element_type=jnp.float32) + bp
            if self.act == "relu":
                mus.append(jnp.mean((z >= 0.0).astype(jnp.float32),
                                    axis=0)[:self.size[i + 1]])
                h = jnp.maximum(z, 0.0)
            else:
                h = jax.nn.sigmoid(z)
        Wt, bp = self.packed[-1]
        y = jnp.dot(h.astype(jnp.bfloat16), Wt,
                    preferred_element_type=jnp.float32) + bp
        y = y[:, :self.size[-1]][:, self._label_ids(label_set)]
        if return_mus:
            return y, jnp.stack(mus)
        return y

    # NOTE: get_classwise_mus() is a host-side DataLoader loop in the original
    # module; the per-layer mus reduction it needs is already in the kernel.


# --------------------------------- demo ------------------------------------ #
if __name__ == "__main__":
    key = jax.random.PRNGKey(0)
    kx, kp1, kp2 = jax.random.split(key, 3)

    size = (32, 64, 64, 10)        # SplitMLP(size=[32, 64, 64, 10])
    batch = 8
    label_set = [1, 3, 5, 7]
    x = jax.random.normal(kx, (batch, size[0]), jnp.float32)

    # default act='relu' (as in SplitMLP), exercise return_mus=True
    model = SplitMLPPallas(size, act="relu", key=kp1)
    y, mus = model.forward(x, label_set, return_mus=True)
    y, mus = jax.block_until_ready((y, mus))
    y_ref, mus_ref = model.forward_ref(x, label_set, return_mus=True)
    assert y.shape == (batch, len(label_set))
    assert mus.shape == (len(size) - 2, size[1])
    assert jnp.allclose(y, y_ref, atol=1e-3, rtol=1e-3), "relu output mismatch"
    assert jnp.allclose(mus, mus_ref, atol=1e-6), "mus mismatch"

    # sigmoid branch, no mus
    model_s = SplitMLPPallas(size, act="sigmoid", key=kp2)
    y_s = jax.block_until_ready(model_s.forward(x, label_set))
    assert jnp.allclose(y_s, model_s.forward_ref(x, label_set),
                        atol=1e-3, rtol=1e-3), "sigmoid output mismatch"

    print("KERNEL_OK")
</pallas_src>

<mosaic_0001>
module attributes {stable_mosaic.version = 11 : i64} {
  func.func @_fused_mlp_kernel(%arg0: memref<8x32xf32, #tpu.memory_space<vmem>>, %arg1: memref<32x128xbf16, #tpu.memory_space<vmem>>, %arg2: memref<1x128xf32, #tpu.memory_space<vmem>>, %arg3: memref<128x128xbf16, #tpu.memory_space<vmem>>, %arg4: memref<1x128xf32, #tpu.memory_space<vmem>>, %arg5: memref<128x128xbf16, #tpu.memory_space<vmem>>, %arg6: memref<1x128xf32, #tpu.memory_space<vmem>>, %arg7: memref<8x128xf32, #tpu.memory_space<vmem>>, %arg8: memref<2x128xf32, #tpu.memory_space<vmem>>) attributes {dimension_semantics = [], scalar_prefetch = 0 : i64, scratch_operands = 0 : i64, tpu.core_type = #tpu.core_type<tc>} {
    %c0 = arith.constant 0 : index
    %c0_0 = arith.constant 0 : index
    %0 = vector.load %arg0[%c0, %c0_0] : memref<8x32xf32, #tpu.memory_space<vmem>>, vector<8x32xf32>
    %1 = arith.truncf %0 : vector<8x32xf32> to vector<8x32xbf16>
    %c0_1 = arith.constant 0 : index
    %c0_2 = arith.constant 0 : index
    %2 = vector.load %arg1[%c0_1, %c0_2] : memref<32x128xbf16, #tpu.memory_space<vmem>>, vector<32x128xbf16>
    %cst = arith.constant dense<0.000000e+00> : vector<8x128xf32>
    %3 = tpu.matmul %1, %2, %cst {dimension_numbers = #tpu.dot_dimension_numbers<[1], [0], [0], [1], [0, 0, 1, 1], [], []>} : vector<8x32xbf16>, vector<32x128xbf16>, vector<8x128xf32> -> vector<8x128xf32>
    %c0_3 = arith.constant 0 : index
    %c0_4 = arith.constant 0 : index
    %4 = vector.load %arg2[%c0_3, %c0_4] : memref<1x128xf32, #tpu.memory_space<vmem>>, vector<1x128xf32>
    %5 = vector.broadcast %4 : vector<1x128xf32> to vector<8x128xf32>
    %6 = arith.addf %3, %5 : vector<8x128xf32>
    %cst_5 = arith.constant 0.000000e+00 : f32
    %7 = vector.broadcast %cst_5 : f32 to vector<8x128xf32>
    %8 = arith.cmpf oge, %6, %7 : vector<8x128xf32>
    %9 = arith.extui %8 : vector<8x128xi1> to vector<8x128xi32>
    %10 = arith.sitofp %9 : vector<8x128xi32> to vector<8x128xf32>
    %cst_6 = arith.constant dense<0.000000e+00> : vector<128xf32>
    %11 = vector.multi_reduction <add>, %10, %cst_6 [0] : vector<8x128xf32> to vector<128xf32>
    %12 = vector.shape_cast %11 : vector<128xf32> to vector<1x128xf32>
    %cst_7 = arith.constant 8.000000e+00 : f32
    %13 = vector.broadcast %cst_7 : f32 to vector<1x128xf32>
    %14 = arith.divf %12, %13 : vector<1x128xf32>
    %cst_8 = arith.constant 0.000000e+00 : f32
    %15 = vector.broadcast %cst_8 : f32 to vector<8x128xf32>
    %16 = arith.maximumf %6, %15 : vector<8x128xf32>
    %17 = arith.truncf %16 : vector<8x128xf32> to vector<8x128xbf16>
    %c0_9 = arith.constant 0 : index
    %c0_10 = arith.constant 0 : index
    %18 = vector.load %arg3[%c0_9, %c0_10] : memref<128x128xbf16, #tpu.memory_space<vmem>>, vector<128x128xbf16>
    %cst_11 = arith.constant dense<0.000000e+00> : vector<8x128xf32>
    %19 = tpu.matmul %17, %18, %cst_11 {dimension_numbers = #tpu.dot_dimension_numbers<[1], [0], [0], [1], [0, 0, 1, 1], [], []>} : vector<8x128xbf16>, vector<128x128xbf16>, vector<8x128xf32> -> vector<8x128xf32>
    %c0_12 = arith.constant 0 : index
    %c0_13 = arith.constant 0 : index
    %20 = vector.load %arg4[%c0_12, %c0_13] : memref<1x128xf32, #tpu.memory_space<vmem>>, vector<1x128xf32>
    %21 = vector.broadcast %20 : vector<1x128xf32> to vector<8x128xf32>
    %22 = arith.addf %19, %21 : vector<8x128xf32>
    %cst_14 = arith.constant 0.000000e+00 : f32
    %23 = vector.broadcast %cst_14 : f32 to vector<8x128xf32>
    %24 = arith.cmpf oge, %22, %23 : vector<8x128xf32>
    %25 = arith.extui %24 : vector<8x128xi1> to vector<8x128xi32>
    %26 = arith.sitofp %25 : vector<8x128xi32> to vector<8x128xf32>
    %cst_15 = arith.constant dense<0.000000e+00> : vector<128xf32>
    %27 = vector.multi_reduction <add>, %26, %cst_15 [0] : vector<8x128xf32> to vector<128xf32>
    %28 = vector.shape_cast %27 : vector<128xf32> to vector<1x128xf32>
    %cst_16 = arith.constant 8.000000e+00 : f32
    %29 = vector.broadcast %cst_16 : f32 to vector<1x128xf32>
    %30 = arith.divf %28, %29 : vector<1x128xf32>
    %cst_17 = arith.constant 0.000000e+00 : f32
    %31 = vector.broadcast %cst_17 : f32 to vector<8x128xf32>
    %32 = arith.maximumf %22, %31 : vector<8x128xf32>
    %33 = arith.truncf %32 : vector<8x128xf32> to vector<8x128xbf16>
    %c0_18 = arith.constant 0 : index
    %c0_19 = arith.constant 0 : index
    %34 = vector.load %arg5[%c0_18, %c0_19] : memref<128x128xbf16, #tpu.memory_space<vmem>>, vector<128x128xbf16>
    %cst_20 = arith.constant dense<0.000000e+00> : vector<8x128xf32>
    %35 = tpu.matmul %33, %34, %cst_20 {dimension_numbers = #tpu.dot_dimension_numbers<[1], [0], [0], [1], [0, 0, 1, 1], [], []>} : vector<8x128xbf16>, vector<128x128xbf16>, vector<8x128xf32> -> vector<8x128xf32>
    %c0_21 = arith.constant 0 : index
    %c0_22 = arith.constant 0 : index
    %36 = vector.load %arg6[%c0_21, %c0_22] : memref<1x128xf32, #tpu.memory_space<vmem>>, vector<1x128xf32>
    %37 = vector.broadcast %36 : vector<1x128xf32> to vector<8x128xf32>
    %38 = arith.addf %35, %37 : vector<8x128xf32>
    %c0_23 = arith.constant 0 : index
    %c0_24 = arith.constant 0 : index
    %39 = vector.load %arg7[%c0_23, %c0_24] : memref<8x128xf32, #tpu.memory_space<vmem>>, vector<8x128xf32>
    tpu.vector_store %arg7[%c0_23, %c0_24], %38 {strides = array<i32>} : memref<8x128xf32, #tpu.memory_space<vmem>>, vector<8x128xf32>,
    %40 = tpu.concatenate %14, %30 in 0 : vector<1x128xf32>, vector<1x128xf32> -> vector<2x128xf32>
    %c0_25 = arith.constant 0 : index
    %c0_26 = arith.constant 0 : index
    %41 = vector.load %arg8[%c0_25, %c0_26] : memref<2x128xf32, #tpu.memory_space<vmem>>, vector<2x128xf32>
    tpu.vector_store %arg8[%c0_25, %c0_26], %40 {strides = array<i32>} : memref<2x128xf32, #tpu.memory_space<vmem>>, vector<2x128xf32>,
    return
  }
}

</mosaic_0001>

<bundles_post_ra>
// kernel: tpu_custom_call.1
= control target key start
LH: loop header
LB: loop body
LE: loop exit
PB: predicated region body
PF: predicated region fallthrough
CT: control target
= control target key end

     0   :  { %14 = vsyncpa [#allocation3], 0  ;;  %s707_s0 = inlined_call_operand.hbm [shape: f32[8,32], index: 0, kind: input, shape index: {}]   ;;  %s708_s1 = inlined_call_operand.hbm [shape: bf16[32,128], index: 1, kind: input, shape index: {}]   ;;  %s709_s2 = inlined_call_operand.vmem [shape: f32[1,128], index: 2, kind: input, shape index: {}]   ;;  %s710_s3 = inlined_call_operand.hbm [shape: bf16[128,128], index: 3, kind: input, shape index: {}]   ;;  %s711_s4 = inlined_call_operand.vmem [shape: f32[1,128], index: 4, kind: input, shape index: {}]   ;;  %s712_s5 = inlined_call_operand.hbm [shape: bf16[128,128], index: 5, kind: input, shape index: {}]   ;;  %s713_s6 = inlined_call_operand.vmem [shape: f32[1,128], index: 6, kind: input, shape index: {}]   ;;  %s714_s7 = inlined_call_operand.hbm [shape: f32[8,128], index: 7, kind: output, shape index: {0}]   ;;  %s715_s8 = inlined_call_operand.hbm [shape: f32[2,128], index: 8, kind: output, shape index: {1}]  }
   0x1   :  { %15 = vsyncpa [#allocation6], 0 }
   0x2   :  { %16 = vsyncpa [#allocation9], 0 }
   0x3   :  { %17 = vsyncpa [#allocation4], 0  ;;  %s34_s29 = sshll.u32 %s708_s1, 4  ;;  %s35_s29 = int_to_ptr.hbm [resolvable:$true] %s34_s29 }
   0x4   :  { %18 = vsyncpa [#allocation12], 0  ;;  %s625_s30 = smov [#allocation5]   ;;  %s24_s12 = sshll.u32 %s707_s0, 4  ;;  %s25_s12 = int_to_ptr.hbm [resolvable:$true] %s24_s12 }
   0x5   :  { %s36_s9 = sshll.u32 %s625_s30, 4  ;;  %s626_s13 = smov 64   ;;  %s37_s9 = int_to_ptr.vmem [resolvable:$true] %s36_s9 }
   0x6   :  { %s627_s14 = smov 4   ;;  %s628_s15 = smov [#allocation2]  }
   0x7   :  { %42 = dma.hbm_to_vmem [thread:$0]  %s35_s29, 256, %s37_s9, [#allocation6], %s626_s13, %s626_s13, %s627_s14  }
   0x8   :  { %s26_s16 = sshll.u32 %s628_s15, 4  ;;  %s49_s19 = sshll.u32 %s710_s3, 4  ;;  %s27_s16 = int_to_ptr.vmem [resolvable:$true] %s26_s16  ;;  %s50_s19 = int_to_ptr.hbm [resolvable:$true] %s49_s19 }
   0x9   :  { %29 = dma.hbm_to_vmem [thread:$0]  %s25_s12, 128, %s27_s16, [#allocation3]  }
   0xa   :  { %s64_s21 = sshll.u32 %s712_s5, 4  ;;  %s629_s22 = smov [#allocation7]   ;;  %s65_s21 = int_to_ptr.hbm [resolvable:$true] %s64_s21 }
   0xb   :  { %s51_s23 = sshll.u32 %s629_s22, 4  ;;  %s630_s0 = smov [#allocation8]   ;;  %s52_s23 = int_to_ptr.vmem [resolvable:$true] %s51_s23 }
   0xc   :  { %57 = dma.hbm_to_vmem [thread:$0]  %s50_s19, 1024, %s52_s23, [#allocation6], %s626_s13, %s626_s13, %s627_s14  }
   0xd   :  { %s66_s24 = sshll.u32 %s630_s0, 4  ;;  %s67_s24 = int_to_ptr.vmem [resolvable:$true] %s66_s24 }
   0xe   :  { %72 = dma.hbm_to_vmem [thread:$0]  %s65_s21, 1024, %s67_s24, [#allocation9], %s626_s13, %s626_s13, %s627_s14  }
   0xf   :  { %615 = dma.done.wait [#allocation3], 128  }
  0x10   :  { %616 = vsyncadd [#allocation3], 4294967168 }
  0x11   :  { %617 = dma.done.wait [#allocation6], 1280  }
  0x12   :  { %618 = vsyncadd [#allocation6], 4294966016 }
  0x13   :  { %619 = dma.done.wait [#allocation9], 1024  }
  0x14   :  { %620 = vsyncadd [#allocation9], 4294966272  ;;  %v439_v0 = vld [vmem:[#allocation5 + $0x8] sm:$0xff]  ;;  %v438_v2 = vld [vmem:[#allocation5] sm:$0xff]  ;;  %vm114_vm0 = vcmask 261120   ;;  %v631_v26 = vmov 8.0  }
  0x15   :  { %v447_v1 = vld [vmem:[#allocation7 + $0x38] sm:$0xff]  ;;  %124 = vmatpush.bf16.msra.mxu0 %v439_v0  ;;  %v92_v3 = vld [vmem:[#allocation2] sm:$0xff]  ;;  %v446_v4 = vld [vmem:[#allocation7 + $0x30] sm:$0xff]  ;;  %469 = vrcp.f32 %v631_v26  ;;  %v632_v27 = vmov 0.0   ;;  %vm325_vm4 = vcmask 1040384   ;;  %s346_s29 = sshll.u32 %s715_s8, 4  ;;  %s347_s29 = int_to_ptr.hbm [resolvable:$true] %s346_s29 }
  0x16   :  { %218 = vmatpush.bf16.msra.mxu1 %v447_v1  ;;  %v93_v5 = vpack.c.bf16 %v92_v3, %v92_v3  ;;  %v445_v6 = vld [vmem:[#allocation7 + $0x28] sm:$0xff]  ;;  %v444_v7 = vld [vmem:[#allocation7 + $0x20] sm:$0xff]  ;;  %v443_v8 = vld [vmem:[#allocation7 + $0x18] sm:$0xff]  ;;  %s634_s10 = smov [#allocation10]   ;;  %s335_s14 = sshll.u32 %s714_s7, 4  ;;  %s336_s14 = int_to_ptr.hbm [resolvable:$true] %s335_s14 }
  0x17   :  { %v442_v9 = vld [vmem:[#allocation7 + $0x10] sm:$0xff]  ;;  %v441_v10 = vld [vmem:[#allocation7 + $0x8] sm:$0xff]  ;;  %v440_v11 = vld [vmem:[#allocation7] sm:$0xff]  ;;  %s333_s11 = sshll.u32 %s634_s10, 4  ;;  %s334_s11 = int_to_ptr.vmem [resolvable:$true] %s333_s11 }
  0x18   :  { %v455_v12 = vld [vmem:[#allocation8 + $0x38] sm:$0xff]  ;;  %v454_v13 = vld [vmem:[#allocation8 + $0x30] sm:$0xff]  ;;  %v453_v14 = vld [vmem:[#allocation8 + $0x28] sm:$0xff] }
  0x19   :  { %125 = vmatpush.bf16.msra.mxu0 %v438_v2  ;;  %311 = vmatpush.bf16.msra.mxu2 %v455_v12  ;;  %v452_v15 = vld [vmem:[#allocation8 + $0x20] sm:$0xff]  ;;  %v466_v16 = vld [vmem:[%s709_s2] ss:$0 sm:$0xff]  ;;  %v451_v17 = vld [vmem:[#allocation8 + $0x18] sm:$0xff] }
  0x1a   :  { %219 = vmatpush.bf16.msra.mxu1 %v446_v4  ;;  %v450_v20 = vld [vmem:[#allocation8 + $0x10] sm:$0xff]  ;;  %v449_v24 = vld [vmem:[#allocation8 + $0x8] sm:$0xff]  ;;  %v448_v25 = vld [vmem:[#allocation8] sm:$0xff] }
  0x1b   :  { %v470_v30 = vpop.eup %469  ;;  %v467_v32 = vld [vmem:[%s711_s4] ss:$0 sm:$0xff]  ;;  %s633_s4 = smov [#allocation11]  }
  0x1c   :  { %371 = vmatmul.msk.bf16.vlgmr.msra.gmra.mxu0 %vm114_vm0, %v93_v5  ;;  %v141_v33 = vmul.f32 8.0, %v470_v30  ;;  %vm145_vm3 = vweird.f32 %v470_v30  ;;  %s344_s26 = sshll.u32 %s633_s4, 4  ;;  %v468_v57 = vld [vmem:[%s713_s6] ss:$0 sm:$0xff]  ;;  %s345_s26 = int_to_ptr.vmem [resolvable:$true] %s344_s26 }
  0x1d   :  { %312 = vmatpush.bf16.msra.mxu2 %v454_v13 }
  0x1e   :  { %220 = vmatpush.bf16.msra.mxu1 %v445_v6  ;;  %v142_v37 = vsub.f32 1.0, %v141_v33 }
  0x20   :  { %v143_v43 = vmul.f32 %v470_v30, %v142_v37 }
  0x21   :  { %313 = vmatpush.bf16.msra.mxu2 %v453_v14 }
  0x22   :  { %221 = vmatpush.bf16.msra.mxu1 %v444_v7  ;;  %v144_v48 = vadd.f32 %v470_v30, %v143_v43 }
  0x24   :  { %v146_v52 = vsel %vm145_vm3, %v470_v30, %v144_v48 }
  0x25   :  { %314 = vmatpush.bf16.msra.mxu2 %v452_v15 }
  0x26   :  { %222 = vmatpush.bf16.msra.mxu1 %v443_v8 }
  0x29   :  { %315 = vmatpush.bf16.msra.mxu2 %v451_v17 }
  0x2a   :  { %223 = vmatpush.bf16.msra.mxu1 %v442_v9 }
  0x2d   :  { %316 = vmatpush.bf16.msra.mxu2 %v450_v20 }
  0x2e   :  { %224 = vmatpush.bf16.msra.mxu1 %v441_v10 }
  0x31   :  { %317 = vmatpush.bf16.msra.mxu2 %v449_v24 }
  0x32   :  { %225 = vmatpush.bf16.msra.mxu1 %v440_v11 }
  0x35   :  { %318 = vmatpush.bf16.msra.mxu2 %v448_v25 }
  0x99   :  { %v127_v18 = vpop.f32.mrf.mxu0 }
  0x9a   :  { %v128_v19 = vadd.f32 %v466_v16, %v127_v18 }
  0x9c   :  { %v148_v21 = vmax.f32 %v128_v19, 0.0  ;;  %vm131_vm1 = vcmp.ge.f32.partialorder %v128_v19, 0.0 }
  0x9d   :  { %v372_v28 = vsel %vm131_vm1, 1.0, %v632_v27 }
  0x9e   :  { %v149_v22 = vpack.c.bf16 %v148_v21, %v148_v21  ;;  %v134_v29 = vrot.slane %v372_v28, 4 }
  0xa0   :  { %226 = vmatmul.bf16.vlgmr.msra.gmra.mxu1 %v149_v22  ;;  %v135_v31 = vadd.f32 %v372_v28, %v134_v29 }
  0xa1   :  { %v129_v23 = vpop.f32.mrf.mxu0 }
  0xa2   :  { %v136_v35 = vrot.slane %v135_v31, 2 }
  0xa4   :  { %v137_v40 = vadd.f32 %v136_v35, %v135_v31 }
  0xa6   :  { %v138_v46 = vrot.slane %v137_v40, 1 }
  0xa8   :  { %v139_v50 = vadd.f32 %v138_v46, %v137_v40 }
  0xaa   :  { %v147_v54 = vmul.f32 %v146_v52, %v139_v50 }
 0x11d   :  { %v227_v34 = vpop.f32.mrf.mxu1 }
 0x11e   :  { %v228_v36 = vadd.f32 %v467_v32, %v227_v34 }
 0x120   :  { %vm231_vm2 = vcmp.ge.f32.partialorder %v228_v36, 0.0  ;;  %v241_v38 = vmax.f32 %v228_v36, 0.0 }
 0x121   :  { %v405_v39 = vsel %vm231_vm2, 1.0, %v632_v27 }
 0x122   :  { %v234_v41 = vrot.slane %v405_v39, 4  ;;  %v242_v42 = vpack.c.bf16 %v241_v38, %v241_v38 }
 0x124   :  { %v235_v44 = vadd.f32 %v405_v39, %v234_v41  ;;  %319 = vmatmul.bf16.vlgmr.msra.gmra.mxu2 %v242_v42 }
 0x125   :  { %v229_v45 = vpop.f32.mrf.mxu1 }
 0x126   :  { %v236_v47 = vrot.slane %v235_v44, 2 }
 0x128   :  { %v237_v49 = vadd.f32 %v236_v47, %v235_v44 }
 0x12a   :  { %v238_v51 = vrot.slane %v237_v49, 1 }
 0x12c   :  { %v239_v53 = vadd.f32 %v238_v51, %v237_v49 }
 0x12e   :  { %v240_v55 = vmul.f32 %v239_v53, %v146_v52 }
 0x130   :  { %v326_v56 = vsel %vm325_vm4, %v147_v54, %v240_v55 }
 0x131   :  { %327 = vst [vmem:[#allocation11] sm:$0x3] %v326_v56 }
 0x132   :  { %349 = dma.vmem_to_hbm [thread:$0]  %s345_s26, 32, %s347_s29, [#allocation12]  }
 0x1a7   :  { %v320_v58 = vpop.f32.mrf.mxu2 }
 0x1a8   :  { %v321_v59 = vadd.f32 %v468_v57, %v320_v58 }
 0x1aa   :  { %324 = vst [vmem:[#allocation10] sm:$0xff] %v321_v59 }
 0x1ab   :  { %338 = dma.vmem_to_hbm [thread:$0]  %s334_s11, 128, %s336_s14, [#allocation4]  }
 0x1af   :  { %v322_v60 = vpop.f32.mrf.mxu2 }
 0x1b0   :  { %621 = dma.done.wait [#allocation4], 128  }
 0x1b1   :  { %622 = vsyncadd [#allocation4], 4294967168 }
 0x1b2   :  { %623 = dma.done.wait [#allocation12], 32  }
 0x1b3   :  { %624 = vsyncadd [#allocation12], 4294967264 }
 0x1b4   :  { %358 = vsyncpa [#allocation3], 1 }
 0x1b5   :  { %359 = vsyncpa [#allocation6], 1 }
 0x1b6   :  { %360 = vsyncpa [#allocation9], 1 }
 0x1b7   :  { %361 = vsyncpa [#allocation4], 1 }
 0x1b8   :  { %362 = vsyncpa [#allocation12], 1 }

</bundles_post_ra>
